<compile_context>
chip_gen: v7x
topology: tpu7x:2x2x1
jax: 0.10.0
libtpu: 0.0.40
codegen_flags: <defaults>
</compile_context>

<pallas_src>
import functools

import jax
import jax.numpy as jnp
from jax.experimental import pallas as pl
from jax.experimental.pallas import tpu as pltpu

LN_EPS = 1e-5                   # torch.nn.LayerNorm default eps
SQRT2 = 1.4142135623730951
VMEM_LIMIT = 48 * 1024 * 1024   # scoped-VMEM budget safe on v5e/v6e/v7x


def _row_tile(n, max_rows=256):
    """Largest divisor of n that is <= max_rows and a multiple of 8.

    Falls back to the full n (legal, but possibly large) when no such divisor
    exists — rely on vmem_limit_bytes to flag pathological sequence lengths.
    """
    if n <= max_rows:
        return n
    for t in range(max_rows, 7, -1):
        if n % t == 0 and t % 8 == 0:
            return t
    return n


def _head_block(heads, dim_head):
    """Smallest group of heads whose merged width is 128-lane aligned."""
    for hb in range(1, heads + 1):
        if heads % hb == 0 and (hb * dim_head) % 128 == 0:
            return hb
    raise ValueError(
        f"flash_attention needs a divisor hb of heads={heads} with "
        f"hb*dim_head % 128 == 0 (dim_head={dim_head}). Use dim_head=128, or "
        "dim_head=64 with an even head count, etc.")


def _erf(x):
    """Abramowitz & Stegun 7.1.26 erf approximation (|err| <= 1.5e-7).

    Built only from mul/add/exp/where so it lowers cleanly on the VPU/EUP.
    """
    a1, a2, a3, a4, a5 = (0.254829592, -0.284496736, 1.421413741,
                          -1.453152027, 1.061405429)
    p = 0.3275911
    ax = jnp.abs(x)
    t = 1.0 / (1.0 + p * ax)
    poly = ((((a5 * t + a4) * t + a3) * t + a2) * t + a1) * t
    y = 1.0 - poly * jnp.exp(-ax * ax)
    return jnp.where(x >= 0, y, -y)


def _gelu(x):
    # exact (erf-based) GELU, matching nn.GELU() up to ~1e-7
    return 0.5 * x * (1.0 + _erf(x * (1.0 / SQRT2)))


# ------------- kernel 1: fused LayerNorm -> single QKV matmul -------------- #

def _ln_qkv_kernel(x_ref, g_ref, beta_ref, w_ref, bias_ref, qkv_ref):
    x = x_ref[0].astype(jnp.float32)                        # (tn, D)
    mu = jnp.mean(x, axis=-1, keepdims=True)
    var = jnp.mean((x - mu) ** 2, axis=-1, keepdims=True)
    xn = (x - mu) * jax.lax.rsqrt(var + LN_EPS)
    xn = xn * g_ref[...] + beta_ref[...]
    # One MXU matmul for Q,K,V together; softmax scale already folded into the
    # Q columns of w/bias at param-prep time.
    qkv = jnp.dot(xn.astype(w_ref.dtype), w_ref[...],
                  preferred_element_type=jnp.float32) + bias_ref[...]
    qkv_ref[0] = qkv.astype(qkv_ref.dtype)                  # single lane-dense store


def ln_qkv(x, gamma, beta, w_qkv, b_qkv):
    B, N, D = x.shape
    three_inner = w_qkv.shape[1]
    tn = _row_tile(N)
    return pl.pallas_call(
        _ln_qkv_kernel,
        out_shape=jax.ShapeDtypeStruct((B, N, three_inner), jnp.bfloat16),
        grid=(B, N // tn),
        in_specs=[
            pl.BlockSpec((1, tn, D), lambda b, i: (b, i, 0)),
            pl.BlockSpec((1, D), lambda b, i: (0, 0)),
            pl.BlockSpec((1, D), lambda b, i: (0, 0)),
            pl.BlockSpec((D, three_inner), lambda b, i: (0, 0)),
            pl.BlockSpec((1, three_inner), lambda b, i: (0, 0)),
        ],
        out_specs=pl.BlockSpec((1, tn, three_inner), lambda b, i: (b, i, 0)),
        compiler_params=pltpu.CompilerParams(
            dimension_semantics=("parallel", "parallel"),
            vmem_limit_bytes=VMEM_LIMIT),
    )(x, gamma.reshape(1, D), beta.reshape(1, D), w_qkv,
      b_qkv.reshape(1, three_inner))


# ------- kernel 2: flash attention, heads on the grid (online softmax) ----- #

def _flash_attn_kernel(q_ref, k_ref, v_ref, o_ref, m_sc, l_sc, acc_sc,
                       *, hb, dim_head):
    ki = pl.program_id(3)

    @pl.when(ki == 0)
    def _init():
        m_sc[...] = jnp.full(m_sc.shape, -jnp.inf, jnp.float32)
        l_sc[...] = jnp.zeros(l_sc.shape, jnp.float32)
        acc_sc[...] = jnp.zeros(acc_sc.shape, jnp.float32)

    q = q_ref[0]                                            # (tq, hb*dim_head) bf16
    k = k_ref[0]                                            # (tk, hb*dim_head) bf16
    v = v_ref[0]

    # hb == 1 at production dim_head (multiple of 128): the loop body runs once
    # on the full, aligned block — no lane slicing, full-width MXU matmuls.
    for j in range(hb):
        lo = j * dim_head
        qh = q[:, lo:lo + dim_head]
        kh = k[:, lo:lo + dim_head]
        vh = v[:, lo:lo + dim_head]
        # scores = qh @ kh^T  (scale pre-folded into W_q); bf16 in, f32 acc
        s = jax.lax.dot_general(qh, kh, (((1,), (1,)), ((), ())),
                                preferred_element_type=jnp.float32)
        m_prev = m_sc[:, j:j + 1]
        m_new = jnp.maximum(m_prev, jnp.max(s, axis=-1, keepdims=True))
        alpha = jnp.exp(m_prev - m_new)
        p = jnp.exp(s - m_new)
        l_sc[:, j:j + 1] = alpha * l_sc[:, j:j + 1] + jnp.sum(p, axis=-1,
                                                              keepdims=True)
        acc_sc[:, lo:lo + dim_head] = alpha * acc_sc[:, lo:lo + dim_head] + jnp.dot(
            p.astype(vh.dtype), vh, preferred_element_type=jnp.float32)
        m_sc[:, j:j + 1] = m_new

    @pl.when(ki == pl.num_programs(3) - 1)
    def _finalize():
        for j in range(hb):
            lo = j * dim_head
            # approx reciprocal runs once per q tile (negligible error/cost);
            # switch to approx=False if bit-closeness to PyTorch matters.
            inv = pl.reciprocal(l_sc[:, j:j + 1], approx=True)
            acc_sc[:, lo:lo + dim_head] = acc_sc[:, lo:lo + dim_head] * inv
        o_ref[0] = acc_sc[...].astype(o_ref.dtype)          # single lane-dense store


def flash_attention(qkv, heads, dim_head):
    """qkv: (B, N, 3*inner) merged slab (q | k | v).  Returns (B, N, inner)."""
    B, N, three_inner = qkv.shape
    inner = three_inner // 3
    hb = _head_block(heads, dim_head)
    nhb = heads // hb              # number of head-blocks on the grid
    hbd = hb * dim_head            # lane width per head-block (multiple of 128)
    tq = _row_tile(N)
    tk = _row_tile(N)
    kern = functools.partial(_flash_attn_kernel, hb=hb, dim_head=dim_head)
    q_spec = pl.BlockSpec((1, tq, hbd), lambda b, h, qi, ki: (b, qi, h))
    k_spec = pl.BlockSpec((1, tk, hbd), lambda b, h, qi, ki: (b, ki, nhb + h))
    v_spec = pl.BlockSpec((1, tk, hbd), lambda b, h, qi, ki: (b, ki, 2 * nhb + h))
    o_spec = pl.BlockSpec((1, tq, hbd), lambda b, h, qi, ki: (b, qi, h))
    return pl.pallas_call(
        kern,
        out_shape=jax.ShapeDtypeStruct((B, N, inner), jnp.bfloat16),
        grid=(B, nhb, N // tq, N // tk),
        in_specs=[q_spec, k_spec, v_spec],
        out_specs=o_spec,
        scratch_shapes=[
            pltpu.VMEM((tq, hb), jnp.float32),      # running max per head
            pltpu.VMEM((tq, hb), jnp.float32),      # running sum per head
            pltpu.VMEM((tq, hbd), jnp.float32),     # lane-dense running output
        ],
        compiler_params=pltpu.CompilerParams(
            dimension_semantics=("parallel", "parallel", "parallel", "arbitrary"),
            vmem_limit_bytes=VMEM_LIMIT),
    )(qkv, qkv, qkv)


# -- kernel 3: out-proj + residual + LayerNorm2 + FFN(GELU) + residual ------ #

def _proj_ffn_kernel(o_ref, res_ref, wo_ref, bo_ref, g_ref, beta_ref,
                     w1_ref, b1_ref, w2_ref, b2_ref, out_ref):
    # attention output projection + residual (f32)
    y = jnp.dot(o_ref[0], wo_ref[...],
                preferred_element_type=jnp.float32) + bo_ref[...]
    x1 = y + res_ref[0].astype(jnp.float32)                 # x after attn block
    # LayerNorm 2
    mu = jnp.mean(x1, axis=-1, keepdims=True)
    var = jnp.mean((x1 - mu) ** 2, axis=-1, keepdims=True)
    xn = (x1 - mu) * jax.lax.rsqrt(var + LN_EPS)
    xn = xn * g_ref[...] + beta_ref[...]
    # FFN: Linear -> GELU -> Linear, then residual
    h = jnp.dot(xn.astype(w1_ref.dtype), w1_ref[...],
                preferred_element_type=jnp.float32) + b1_ref[...]
    h = _gelu(h)
    y2 = jnp.dot(h.astype(w2_ref.dtype), w2_ref[...],
                 preferred_element_type=jnp.float32) + b2_ref[...]
    out_ref[0] = (y2 + x1).astype(out_ref.dtype)


def attn_proj_ffn_residual(o, x, w_out, b_out, ln2_g, ln2_b, w1, b1, w2, b2):
    B, N, inner = o.shape
    D = x.shape[-1]
    Hd = w1.shape[1]
    tn = _row_tile(N)
    row_d = pl.BlockSpec((1, tn, D), lambda b, i: (b, i, 0))

    def const(r, c):
        return pl.BlockSpec((r, c), lambda b, i: (0, 0))

    return pl.pallas_call(
        _proj_ffn_kernel,
        out_shape=jax.ShapeDtypeStruct((B, N, D), x.dtype),
        grid=(B, N // tn),
        in_specs=[
            pl.BlockSpec((1, tn, inner), lambda b, i: (b, i, 0)),   # attn out
            row_d,                                                  # residual x
            const(inner, D), const(1, D),                           # w_out, b_out
            const(1, D), const(1, D),                               # ln2 gamma/beta
            const(D, Hd), const(1, Hd),                             # w1, b1
            const(Hd, D), const(1, D),                              # w2, b2
        ],
        out_specs=row_d,
        compiler_params=pltpu.CompilerParams(
            dimension_semantics=("parallel", "parallel"),
            vmem_limit_bytes=VMEM_LIMIT),
    )(o, x, w_out, b_out.reshape(1, D), ln2_g.reshape(1, D), ln2_b.reshape(1, D),
      w1, b1.reshape(1, Hd), w2, b2.reshape(1, D))


# ------------------------------- model glue -------------------------------- #

def init_params(key, depth, dim, heads, dim_head, mlp_dim):
    inner = heads * dim_head
    scale = float(dim_head) ** -0.5
    params = []
    for _ in range(depth):
        key, kq, kk, kv, ko, kob, k1, k1b, k2, k2b = jax.random.split(key, 10)
        w_q = 0.02 * jax.random.normal(kq, (dim, inner), jnp.float32)
        w_k = 0.02 * jax.random.normal(kk, (dim, inner), jnp.float32)
        w_v = 0.02 * jax.random.normal(kv, (dim, inner), jnp.float32)
        b_q = jnp.zeros((inner,), jnp.float32)
        b_k = jnp.zeros((inner,), jnp.float32)
        b_v = jnp.zeros((inner,), jnp.float32)
        # Fuse Q/K/V into one (D, 3*inner) matmul and fold the softmax scale
        # into the Q projection (weights in bf16: MXU operands).
        w_qkv = jnp.concatenate([w_q * scale, w_k, w_v], axis=1).astype(jnp.bfloat16)
        b_qkv = jnp.concatenate([b_q * scale, b_k, b_v], axis=0)
        params.append(dict(
            ln1_g=jnp.ones((dim,), jnp.float32),
            ln1_b=jnp.zeros((dim,), jnp.float32),
            w_qkv=w_qkv,
            b_qkv=b_qkv,
            w_out=(0.02 * jax.random.normal(ko, (inner, dim))).astype(jnp.bfloat16),
            b_out=0.02 * jax.random.normal(kob, (dim,), jnp.float32),
            ln2_g=jnp.ones((dim,), jnp.float32),
            ln2_b=jnp.zeros((dim,), jnp.float32),
            w1=(0.02 * jax.random.normal(k1, (dim, mlp_dim))).astype(jnp.bfloat16),
            b1=0.02 * jax.random.normal(k1b, (mlp_dim,), jnp.float32),
            w2=(0.02 * jax.random.normal(k2, (mlp_dim, dim))).astype(jnp.bfloat16),
            b2=0.02 * jax.random.normal(k2b, (dim,), jnp.float32),
        ))
    return params


def sparse_transformer_forward(x, params, heads, dim_head):
    """x: (B, N, D) f32.  Mirrors: for attn, ff: x = attn(ln(x))+x; x = ff(ln(x))+x."""
    for layer in params:
        # --- PreNorm + QKV (1 fused call) ---
        qkv = ln_qkv(x, layer["ln1_g"], layer["ln1_b"],
                     layer["w_qkv"], layer["b_qkv"])
        # --- multi-head flash attention, heads on the grid (1 call) ---
        o = flash_attention(qkv, heads, dim_head)            # (B, N, inner)
        # --- out-proj + residual + PreNorm + FFN + residual (1 fused call) ---
        x = attn_proj_ffn_residual(o, x, layer["w_out"], layer["b_out"],
                                   layer["ln2_g"], layer["ln2_b"],
                                   layer["w1"], layer["b1"],
                                   layer["w2"], layer["b2"])
    return x


if __name__ == "__main__":
    # Small demo shapes, but with 128-lane-aligned head width so the attention
    # kernel exercises the clean (no lane-slice) path.  NOTE: do not benchmark
    # at these shapes — tune tiles at production sizes (N>=1k, D>=512).
    B, N, D = 2, 16, 128          # batch, sequence, model dim
    heads, dim_head = 2, 128
    mlp_dim, depth = 256, 2

    key = jax.random.PRNGKey(0)
    kx, kp = jax.random.split(key)
    x = jax.random.normal(kx, (B, N, D), jnp.float32)
    params = init_params(kp, depth, D, heads, dim_head, mlp_dim)

    out = sparse_transformer_forward(x, params, heads, dim_head)
    out = jax.block_until_ready(out)
    assert out.shape == (B, N, D) and out.dtype == jnp.float32
    assert bool(jnp.all(jnp.isfinite(out)))
    print("KERNEL_OK")
</pallas_src>

<mosaic_0001>
module attributes {stable_mosaic.version = 11 : i64} {
  func.func @_ln_qkv_kernel(%arg0: i32, %arg1: i32, %arg2: memref<1x16x128xf32, #tpu.memory_space<vmem>>, %arg3: memref<1x128xf32, #tpu.memory_space<vmem>>, %arg4: memref<1x128xf32, #tpu.memory_space<vmem>>, %arg5: memref<128x768xbf16, #tpu.memory_space<vmem>>, %arg6: memref<1x768xf32, #tpu.memory_space<vmem>>, %arg7: memref<1x16x768xbf16, #tpu.memory_space<vmem>>) attributes {dimension_semantics = [#tpu.dimension_semantics<parallel>, #tpu.dimension_semantics<parallel>], iteration_bounds = array<i64: 2, 1>, scalar_prefetch = 0 : i64, scratch_operands = 0 : i64, tpu.core_type = #tpu.core_type<tc>, window_params = [{transform_indices = @transform_0, window_bounds = array<i64: 1, 16, 128>}, {pipeline_mode = #tpu.pipeline_mode<synchronous>, transform_indices = @transform_1, window_bounds = array<i64: 1, 128>}, {pipeline_mode = #tpu.pipeline_mode<synchronous>, transform_indices = @transform_2, window_bounds = array<i64: 1, 128>}, {pipeline_mode = #tpu.pipeline_mode<synchronous>, transform_indices = @transform_3, window_bounds = array<i64: 128, 768>}, {pipeline_mode = #tpu.pipeline_mode<synchronous>, transform_indices = @transform_4, window_bounds = array<i64: 1, 768>}, {transform_indices = @transform_5, window_bounds = array<i64: 1, 16, 768>}]} {
    %c0 = arith.constant 0 : index
    %c0_0 = arith.constant 0 : index
    %c0_1 = arith.constant 0 : index
    %0 = vector.load %arg2[%c0, %c0_0, %c0_1] : memref<1x16x128xf32, #tpu.memory_space<vmem>>, vector<1x16x128xf32>
    %1 = vector.shape_cast %0 : vector<1x16x128xf32> to vector<16x128xf32>
    %cst = arith.constant dense<0.000000e+00> : vector<16xf32>
    %2 = vector.multi_reduction <add>, %1, %cst [1] : vector<16x128xf32> to vector<16xf32>
    %3 = vector.shape_cast %2 : vector<16xf32> to vector<16x1xf32>
    %cst_2 = arith.constant 1.280000e+02 : f32
    %4 = vector.broadcast %cst_2 : f32 to vector<16x1xf32>
    %5 = arith.divf %3, %4 : vector<16x1xf32>
    %6 = vector.broadcast %5 : vector<16x1xf32> to vector<16x128xf32>
    %7 = arith.subf %1, %6 : vector<16x128xf32>
    %8 = arith.mulf %7, %7 : vector<16x128xf32>
    %cst_3 = arith.constant dense<0.000000e+00> : vector<16xf32>
    %9 = vector.multi_reduction <add>, %8, %cst_3 [1] : vector<16x128xf32> to vector<16xf32>
    %10 = vector.shape_cast %9 : vector<16xf32> to vector<16x1xf32>
    %cst_4 = arith.constant 1.280000e+02 : f32
    %11 = vector.broadcast %cst_4 : f32 to vector<16x1xf32>
    %12 = arith.divf %10, %11 : vector<16x1xf32>
    %13 = vector.broadcast %5 : vector<16x1xf32> to vector<16x128xf32>
    %14 = arith.subf %1, %13 : vector<16x128xf32>
    %cst_5 = arith.constant 9.99999974E-6 : f32
    %15 = vector.broadcast %cst_5 : f32 to vector<16x1xf32>
    %16 = arith.addf %12, %15 : vector<16x1xf32>
    %17 = math.rsqrt %16 : vector<16x1xf32>
    %18 = vector.broadcast %17 : vector<16x1xf32> to vector<16x128xf32>
    %19 = arith.mulf %14, %18 : vector<16x128xf32>
    %c0_6 = arith.constant 0 : index
    %c0_7 = arith.constant 0 : index
    %20 = vector.load %arg3[%c0_6, %c0_7] : memref<1x128xf32, #tpu.memory_space<vmem>>, vector<1x128xf32>
    %21 = vector.broadcast %20 : vector<1x128xf32> to vector<16x128xf32>
    %22 = arith.mulf %19, %21 : vector<16x128xf32>
    %c0_8 = arith.constant 0 : index
    %c0_9 = arith.constant 0 : index
    %23 = vector.load %arg4[%c0_8, %c0_9] : memref<1x128xf32, #tpu.memory_space<vmem>>, vector<1x128xf32>
    %24 = vector.broadcast %23 : vector<1x128xf32> to vector<16x128xf32>
    %25 = arith.addf %22, %24 : vector<16x128xf32>
    %26 = arith.truncf %25 : vector<16x128xf32> to vector<16x128xbf16>
    %c0_10 = arith.constant 0 : index
    %c0_11 = arith.constant 0 : index
    %27 = vector.load %arg5[%c0_10, %c0_11] : memref<128x768xbf16, #tpu.memory_space<vmem>>, vector<128x768xbf16>
    %cst_12 = arith.constant dense<0.000000e+00> : vector<16x768xf32>
    %28 = tpu.matmul %26, %27, %cst_12 {dimension_numbers = #tpu.dot_dimension_numbers<[1], [0], [0], [1], [0, 0, 1, 1], [], []>} : vector<16x128xbf16>, vector<128x768xbf16>, vector<16x768xf32> -> vector<16x768xf32>
    %c0_13 = arith.constant 0 : index
    %c0_14 = arith.constant 0 : index
    %29 = vector.load %arg6[%c0_13, %c0_14] : memref<1x768xf32, #tpu.memory_space<vmem>>, vector<1x768xf32>
    %30 = vector.broadcast %29 : vector<1x768xf32> to vector<16x768xf32>
    %31 = arith.addf %28, %30 : vector<16x768xf32>
    %32 = arith.truncf %31 : vector<16x768xf32> to vector<16x768xbf16>
    %c0_15 = arith.constant 0 : index
    %c0_16 = arith.constant 0 : index
    %c0_17 = arith.constant 0 : index
    %33 = vector.load %arg7[%c0_15, %c0_16, %c0_17] : memref<1x16x768xbf16, #tpu.memory_space<vmem>>, vector<1x16x768xbf16>
    %34 = vector.shape_cast %33 : vector<1x16x768xbf16> to vector<16x768xbf16>
    %35 = vector.shape_cast %32 : vector<16x768xbf16> to vector<1x16x768xbf16>
    tpu.vector_store %arg7[%c0_15, %c0_16, %c0_17], %35 {strides = array<i32>} : memref<1x16x768xbf16, #tpu.memory_space<vmem>>, vector<1x16x768xbf16>,
    return
  }
  func.func @transform_0(%arg0: i32, %arg1: i32) -> (i32, i32, i32) {
    %c0_i32 = arith.constant 0 : i32
    %c0_i32_0 = arith.constant 0 : i32
    return %arg0, %arg1, %c0_i32 : i32, i32, i32
  }
  func.func @transform_1(%arg0: i32, %arg1: i32) -> (i32, i32) {
    %c0_i32 = arith.constant 0 : i32
    %c0_i32_0 = arith.constant 0 : i32
    %c0_i32_1 = arith.constant 0 : i32
    return %c0_i32, %c0_i32_0 : i32, i32
  }
  func.func @transform_2(%arg0: i32, %arg1: i32) -> (i32, i32) {
    %c0_i32 = arith.constant 0 : i32
    %c0_i32_0 = arith.constant 0 : i32
    %c0_i32_1 = arith.constant 0 : i32
    return %c0_i32, %c0_i32_0 : i32, i32
  }
  func.func @transform_3(%arg0: i32, %arg1: i32) -> (i32, i32) {
    %c0_i32 = arith.constant 0 : i32
    %c0_i32_0 = arith.constant 0 : i32
    %c0_i32_1 = arith.constant 0 : i32
    return %c0_i32, %c0_i32_0 : i32, i32
  }
  func.func @transform_4(%arg0: i32, %arg1: i32) -> (i32, i32) {
    %c0_i32 = arith.constant 0 : i32
    %c0_i32_0 = arith.constant 0 : i32
    %c0_i32_1 = arith.constant 0 : i32
    return %c0_i32, %c0_i32_0 : i32, i32
  }
  func.func @transform_5(%arg0: i32, %arg1: i32) -> (i32, i32, i32) {
    %c0_i32 = arith.constant 0 : i32
    %c0_i32_0 = arith.constant 0 : i32
    return %arg0, %arg1, %c0_i32 : i32, i32, i32
  }
}

</mosaic_0001>

<bundles_post_ra>
// kernel: tpu_custom_call.1
= control target key start
LH: loop header
LB: loop body
LE: loop exit
PB: predicated region body
PF: predicated region fallthrough
CT: control target
= control target key end

     0   :  { %10 = vsyncpa [#allocation3], 0  ;;  %s1588_s0 = inlined_call_operand.hbm [shape: f32[2,16,128], index: 0, kind: input, shape index: {}]   ;;  %s1589_s1 = inlined_call_operand.vmem [shape: f32[1,128], index: 1, kind: input, shape index: {}]   ;;  %s1590_s2 = inlined_call_operand.vmem [shape: f32[1,128], index: 2, kind: input, shape index: {}]   ;;  %s1591_s3 = inlined_call_operand.hbm [shape: bf16[128,768], index: 3, kind: input, shape index: {}]   ;;  %s1592_s4 = inlined_call_operand.vmem [shape: f32[1,768], index: 4, kind: input, shape index: {}]   ;;  %s1593_s5 = inlined_call_operand.hbm [shape: bf16[2,16,768], index: 5, kind: output, shape index: {}]  }
   0x1   :  { %12 = vsyncpa [#allocation3 + $0x1], 0 }
   0x2   :  { %13 = vsyncpa [#allocation6], 0 }
   0x3   :  { %14 = vsyncpa [#allocation4], 0 }
   0x4   :  { %16 = vsyncpa [#allocation4 + $0x1], 0  ;;  %s1349_s18 = smov 0   ;;  %s1351_s19 = smov 0  }
   0x5   :  { %s1353_s20 = smov 0   ;;  %s1355_s21 = smov 0  }
   0x6   :  { %s1357_s22 = smov 0   ;;  %s1359_s23 = smov 0  }
   0x7 LB: > { %s928_s24 = sadd.s32 4294967295, %s1307_s23   ;;  %s929_s25 = sadd.s32 4294967294, %s1307_s23   ;;  %s1307_s23 = sphi %s1359_s23, %s22_s23   ;;  %s1303_s22 = sphi %s1357_s22, %s1617_s22   ;;  %s1299_s21 = sphi %s1355_s21, %s1616_s21   ;;  %s1295_s20 = sphi %s1353_s20, %s1615_s20   ;;  %s1291_s19 = sphi %s1351_s19, %s1614_s19   ;;  %s1287_s18 = sphi %s1349_s18, %s1613_s18  }
   0x8   : > { %p56_p0 = scmp.ne.s32.totalorder %s1291_s19, %s1287_s18  ;;  %p1383_p1 = scmp.eq.s32.totalorder %s928_s24, 0 }
   0x9   : > { %p1387_p2 = scmp.eq.s32.totalorder %s928_s24, 1  ;;  %p172_p3 = scmp.eq.s32.totalorder %s929_s25, 1 }
   0xa   : > { %s1598_s26 = scalar_select %p1383_p1, 1, 0 }
   0xb   : > { %s1599_s27 = scalar_select %p1387_p2, 1, 0 }
   0xc   : > { %p1393_p4 = por %p1383_p1, %p56_p0  ;;  %p930_p5 = scmp.ge.s32.totalorder %s1307_s23, 1 }
   0xd   : > { %p1398_p6 = por %p172_p3, %p56_p0  ;;  %p179_p7 = scmp.lt.s32.totalorder %s1307_s23, 3 }
   0xe   : > { %s1600_s28 = scalar_select %p1393_p4, 1, 0 }
   0xf   : > { %s1601_s29 = scalar_select %p1398_p6, 1, 0 }
  0x10   : > { %p1403_p8 = pnand %p930_p5, %p179_p7  ;;  %s1309_s6 = smov [#allocation5]  }
  0x11   : > { %s197_s7 = sshll.u32 %s1309_s6, 4  ;;  %s34_s9 = sadd.s32 1, %s1303_s22  ;;  %s198_s7 = int_to_ptr.vmem [resolvable:$true] %s197_s7 }
  0x12   : > { %s1602_s30 = scalar_select %p1403_p8, 1, 0 }
  0x13   : > { %p1015_p9 = pneg %p1403_p8  ;;  %s1163_s12 = scalar_lea.hbm %s1591_s3, 6144 }
  0x14   : > { %p1164_p12 = scmp.ne.s32.totalorder %s1591_s3, %s1163_s12  ;;  %p1170_p5 = scmp.lt.u32.totalorder %s1163_s12, %s1591_s3 }
  0x15   : > { %p1412_p11 = pnand %p1015_p9, %p1383_p1 }
  0x17   : > { %p1165_p13 = pneg %p1412_p11 }
  0x19   : > { %p1166_p0 = pnand %p1165_p13, %p1164_p12 }
  0x1b   : > { %p1167_p3 = pneg %p1166_p0 }
  0x1d   : > { %p1172_p7 = pnand %p1170_p5, %p1167_p3 }
  0x1f   : > { %1175 = shalt.err (!%p1172_p7)
}
  0x20   : > { %s1176_s17 = scalar_lea.vmem %s198_s7, 6144  ;;  %p1184_p1 = scmp.lt.s32.totalorder %s198_s7, %s198_s7 }
  0x21   : > { %p1177_p9 = scmp.ne.s32.totalorder %s198_s7, %s1176_s17  ;;  %p1185_p4 = scmp.lt.s32.totalorder %s1176_s17, %s1176_s17 }
  0x23   : > { %p1179_p10 = pnand %p1177_p9, %p1165_p13  ;;  %p1186_p8 = por %p1185_p4, %p1184_p1 }
  0x25   : > { %p1180_p6 = pneg %p1179_p10 }
  0x27   : > { %p1187_p2 = pnand %p1186_p8, %p1180_p6 }
  0x29   : > { %1190 = shalt.err (!%p1187_p2)
}
  0x2a   : > { %s1310_s24 = smov 384   ;;  %s1311_s25 = smov 24  }
  0x2b   : > { %1018 = dma.hbm_to_vmem [thread:$0]  (!%p1412_p11), %s1591_s3, 6144, %s198_s7, [#allocation6], %s1310_s24, %s1310_s24, %s1311_s25  }
  0x2c   : > { %p36_p1 = scmp.ge.s32.totalorder %s34_s9, 2  ;;  %s43_s11 = sadd.s32 1, %s1295_s20 }
  0x2d   : > { %p50_p2 = scmp.ne.s32.totalorder %s1295_s20, %s1291_s19  ;;  %p51_p4 = scmp.eq.s32.totalorder %s1307_s23, 0 }
  0x2e   : > { %s1619_s9 = smov (%p36_p1, %s34_s9), 0  ;;  %p1605_p8 = scmp.ne.s32.totalorder %s1599_s27, 0 }
  0x2f   : > { %p1439_p6 = por %p51_p4, %p50_p2  ;;  %s38_s8 = ssub.s32 %s1303_s22, %s1619_s9 }
  0x30   : > { %p1445_p10 = por %p1605_p8, %p50_p2  ;;  %p1028_p12 = scmp.lt.s32.totalorder %s1307_s23, 2 }
  0x31   : > { %p41_p11 = scmp.eq.s32.totalorder %s38_s8, 0  ;;  %s214_s7 = sand.u32 1, %s1295_s20  }
  0x32   : > { %s933_s14 = sshll.u32 %s214_s7, 4  ;;  %s998_s16 = sshll.u32 %s1303_s22, 8 }
  0x33   : > { %s1454_s15 = scalar_select %p41_p11, %s1295_s20, %s43_s11  }
  0x34   : > { %s1460_s25 = scalar_lea.hbm %s1588_s0, %s998_s16  ;;  %s218_s27 = scalar_lea.vmem [#allocation2], %s933_s14 }
  0x35   : > { %s227_s6 = sshll.u32 %s218_s27, 4  ;;  %p1466_p13 = pnand %p1028_p12, %p1439_p6  ;;  %s1462_s6 = int_to_ptr.vmem [resolvable:$true] %s227_s6 }
  0x36   : > { %s1470_s11 = scalar_lea.sflag [#allocation3], %s214_s7  ;;  %s1191_s8 = scalar_lea.hbm %s1460_s25, 256 }
  0x37   : > { %p1192_p0 = scmp.ne.s32.totalorder %s1460_s25, %s1191_s8  ;;  %p1193_p3 = pneg %p1466_p13 }
  0x38   : > { %s1196_s12 = scalar_lea.hbm %s1588_s0, 512  ;;  %p1197_p9 = scmp.lt.u32.totalorder %s1460_s25, %s1588_s0 }
  0x39   : > { %p1194_p5 = pnand %p1193_p3, %p1192_p0  ;;  %p1198_p1 = scmp.lt.u32.totalorder %s1196_s12, %s1191_s8 }
  0x3a   : > { %p1200_p4 = scmp.lt.u32.totalorder %s1191_s8, %s1460_s25 }
  0x3b   : > { %p1195_p7 = pneg %p1194_p5  ;;  %p1199_p2 = por %p1198_p1, %p1197_p9 }
  0x3d   : > { %p1201_p6 = por %p1200_p4, %p1199_p2 }
  0x3f   : > { %p1202_p8 = pnand %p1201_p6, %p1195_p7 }
  0x41   : > { %1205 = shalt.err (!%p1202_p8)
}
  0x42   : > { %s1206_s7 = scalar_lea.vmem %s1462_s6, 256  ;;  %s1312_s27 = smov [#allocation2]  }
  0x43   : > { %p1207_p12 = scmp.ne.s32.totalorder %s1462_s6, %s1206_s7  ;;  %s1211_s14 = sshll.u32 %s1312_s27, 4  ;;  %s1212_s14 = int_to_ptr.vmem [resolvable:$false] %s1211_s14 }
  0x44   : > { %s1213_s16 = scalar_lea.vmem %s1212_s14, 512  ;;  %p1214_p5 = scmp.lt.s32.totalorder %s1462_s6, %s1212_s14 }
  0x45   : > { %p1209_p11 = pnand %p1207_p12, %p1193_p3  ;;  %p1215_p9 = scmp.lt.s32.totalorder %s1213_s16, %s1206_s7 }
  0x47   : > { %p1210_p0 = pneg %p1209_p11  ;;  %p1216_p1 = por %p1215_p9, %p1214_p5 }
  0x49   : > { %p1217_p2 = pnand %p1216_p1, %p1210_p0 }
  0x4b   : > { %1220 = shalt.err (!%p1217_p2)
}
  0x4c   : > { %s1313_s8 = smov 128   ;;  %s1314_s12 = smov 8  }
  0x4d   : > { %1022 = dma.hbm_to_vmem [thread:$0]  (!%p1466_p13), %s1460_s25, 256, %s1462_s6, %s1470_s11, %s1313_s8, %s1313_s8, %s1314_s12  }
  0x4e   : > { %p1608_p3 = scmp.ne.s32.totalorder %s1602_s30, 0 }
  0x4f   : > { %s1501_s17 = sand.u32 (!%p1608_p3), 1, %s1291_s19   ;;  %p1609_p7 = scmp.ne.s32.totalorder (!%p1608_p3), %s1600_s28, 0 }
  0x50   : > { %239 = sbr.rel (%p1608_p3) target bundleno = 675 (0x2a3), region = 40  ;;  %s937_s24 = sshll.u32 (!%p1608_p3), %s1501_s17, 4 }
  0x51   : > { %s242_s7 = scalar_lea.sflag (!%p1608_p3), [#allocation3], %s1501_s17  ;;  %s245_s27 = scalar_lea.vmem (!%p1608_p3), [#allocation2], %s937_s24 }
  0x57   : > { %1274 = dma.done.wait (%p1609_p7), %s242_s7, 256  }
  0x58   : > { %1276 = vsyncadd (%p1609_p7), %s242_s7, 4294967040  ;;  %p1610_p4 = scmp.ne.s32.totalorder %s1598_s26, 0 }
  0x5a   : > { %1278 = dma.done.wait (%p1610_p4), [#allocation6], 6144  }
  0x5b   : > { %1280 = vsyncadd (%p1610_p4), [#allocation6], 4294961152  ;;  %v279_v0 = vld [vmem:[%s245_s27] sm:$0xff]  ;;  %v280_v1 = vld [vmem:[%s245_s27 + $0x8] sm:$0xff]  ;;  %v1315_v36 = vmov 0   ;;  %s1005_s11 = smul.u32 48, %s1501_s17 }
  0x5c   : > { %281 = vadd.xlane.f32.xlu0 %v279_v0  ;;  %v1087_v2 = vld [vmem:[#allocation5 + $0x4] ss:$24 sps:$4 sm:$0xff]   ;;  %v1089_v3 = vld [vmem:[#allocation5] ss:$24 sps:$4 sm:$0xff]   ;;  %v1093_v6 = vld [vmem:[#allocation5 + $0x34] ss:$24 sps:$4 sm:$0xff]   ;;  %675 = vmatprep.mubr.bf16.mxu0 %v1315_v36 }
  0x5d   : > { %v1090_v4 = vld [vmem:[#allocation5 + $0xc] ss:$24 sps:$4 sm:$0xff]   ;;  %v1092_v5 = vld [vmem:[#allocation5 + $0x8] ss:$24 sps:$4 sm:$0xff]   ;;  %643 = vmatprep.subr.bf16.mxu0 %v1087_v2  ;;  %v1096_v7 = vld [vmem:[#allocation5 + $0x3c] ss:$24 sps:$4 sm:$0xff]   ;;  %718 = vmatprep.mubr.bf16.mxu1 %v1315_v36 }
  0x5e   : > { %686 = vmatprep.subr.bf16.mxu1 %v1090_v4  ;;  %644 = vmatpush1.bf16.msra.mxu0 %v1089_v3  ;;  %v1095_v8 = vld [vmem:[#allocation5 + $0x30] ss:$24 sps:$4 sm:$0xff]   ;;  %v1099_v18 = vld [vmem:[#allocation5 + $0x64] ss:$24 sps:$4 sm:$0xff]   ;;  %v1101_v19 = vld [vmem:[#allocation5 + $0x60] ss:$24 sps:$4 sm:$0xff]  }
  0x5f   : > { %687 = vmatpush1.bf16.msra.mxu1 %v1092_v5  ;;  %645 = vmatprep.subr.bf16.mxu0 %v1093_v6  ;;  %v1098_v17 = vld [vmem:[#allocation5 + $0x38] ss:$24 sps:$4 sm:$0xff]   ;;  %v1102_v20 = vld [vmem:[#allocation5 + $0x6c] ss:$24 sps:$4 sm:$0xff]   ;;  %v1104_v21 = vld [vmem:[#allocation5 + $0x68] ss:$24 sps:$4 sm:$0xff]  }
  0x60   : > { %283 = vadd.xlane.f32.xlu0 %v280_v1  ;;  %688 = vmatprep.subr.bf16.mxu1 %v1096_v7  ;;  %v1105_v22 = vld [vmem:[#allocation5 + $0x94] ss:$24 sps:$4 sm:$0xff]   ;;  %v1107_v23 = vld [vmem:[#allocation5 + $0x90] ss:$24 sps:$4 sm:$0xff]   ;;  %v1111_v26 = vld [vmem:[#allocation5 + $0xc4] ss:$24 sps:$4 sm:$0xff]  }
  0x61   : > { %v1108_v24 = vld [vmem:[#allocation5 + $0x9c] ss:$24 sps:$4 sm:$0xff]   ;;  %v1110_v25 = vld [vmem:[#allocation5 + $0x98] ss:$24 sps:$4 sm:$0xff]   ;;  %v1114_v28 = vld [vmem:[#allocation5 + $0xcc] ss:$24 sps:$4 sm:$0xff]  }
  0x62   : > { %646 = vmatpush1.bf16.msra.mxu0 %v1095_v8  ;;  %v1113_v27 = vld [vmem:[#allocation5 + $0xc0] ss:$24 sps:$4 sm:$0xff]   ;;  %v1117_v30 = vld [vmem:[#allocation5 + $0xf4] ss:$24 sps:$4 sm:$0xff]   ;;  %v1119_v32 = vld [vmem:[#allocation5 + $0xf0] ss:$24 sps:$4 sm:$0xff]  }
  0x63   : > { %689 = vmatpush1.bf16.msra.mxu1 %v1098_v17  ;;  %647 = vmatprep.subr.bf16.mxu0 %v1099_v18  ;;  %v1116_v29 = vld [vmem:[#allocation5 + $0xc8] ss:$24 sps:$4 sm:$0xff]   ;;  %v1120_v31 = vld [vmem:[#allocation5 + $0xfc] ss:$24 sps:$4 sm:$0xff]   ;;  %v1122_v33 = vld [vmem:[#allocation5 + $0xf8] ss:$24 sps:$4 sm:$0xff]  }
  0x64   : > { %690 = vmatprep.subr.bf16.mxu1 %v1102_v20  ;;  %v1123_v34 = vld [vmem:[#allocation5 + $0x124] ss:$24 sps:$4 sm:$0xff]   ;;  %v1125_v37 = vld [vmem:[#allocation5 + $0x120] ss:$24 sps:$4 sm:$0xff]   ;;  %v1129_v39 = vld [vmem:[#allocation5 + $0x154] ss:$24 sps:$4 sm:$0xff]  }
  0x65   : > { %v1126_v35 = vld [vmem:[#allocation5 + $0x12c] ss:$24 sps:$4 sm:$0xff]   ;;  %v1128_v38 = vld [vmem:[#allocation5 + $0x128] ss:$24 sps:$4 sm:$0xff]   ;;  %v1132_v40 = vld [vmem:[#allocation5 + $0x15c] ss:$24 sps:$4 sm:$0xff]  }
  0x66   : > { %648 = vmatpush1.bf16.msra.mxu0 %v1101_v19  ;;  %v1131_v41 = vld [vmem:[#allocation5 + $0x150] ss:$24 sps:$4 sm:$0xff]   ;;  %v1137_v43 = vld [vmem:[#allocation5 + $0x14] ss:$24 sps:$4 sm:$0xff]   ;;  %v939_v52 = vld [vmem:[%s1589_s1] ss:$0 sm:$0xff] }
  0x67   : > { %691 = vmatpush1.bf16.msra.mxu1 %v1104_v21  ;;  %649 = vmatprep.subr.bf16.mxu0 %v1105_v22  ;;  %v1134_v42 = vld [vmem:[#allocation5 + $0x158] ss:$24 sps:$4 sm:$0xff]   ;;  %v940_v56 = vld [vmem:[%s1590_s2] ss:$0 sm:$0xff]  ;;  %v1140_v62 = vld [vmem:[#allocation5 + $0x44] ss:$24 sps:$4 sm:$0xff]  }
  0x68   : > { %692 = vmatprep.subr.bf16.mxu1 %v1108_v24  ;;  %v1135_v60 = vld [vmem:[#allocation5 + $0x10] ss:$24 sps:$4 sm:$0xff]   ;;  %v1138_v63 = vld [vmem:[#allocation5 + $0x40] ss:$24 sps:$4 sm:$0xff]   ;;  %v1146_v2 = vld [vmem:[#allocation5 + $0xa4] ss:$24 sps:$4 sm:$0xff]  }
  0x69   : > { %v1144_v3 = vld [vmem:[#allocation5 + $0xa0] ss:$24 sps:$4 sm:$0xff]   ;;  %v1149_v4 = vld [vmem:[#allocation5 + $0xd4] ss:$24 sps:$4 sm:$0xff]   ;;  %v1147_v5 = vld [vmem:[#allocation5 + $0xd0] ss:$24 sps:$4 sm:$0xff]  }
  0x6a   : > { %650 = vmatpush1.bf16.msra.mxu0 %v1107_v23  ;;  %v1152_v6 = vld [vmem:[#allocation5 + $0x104] ss:$24 sps:$4 sm:$0xff]   ;;  %v1150_v7 = vld [vmem:[#allocation5 + $0x100] ss:$24 sps:$4 sm:$0xff]   ;;  %v1155_v8 = vld [vmem:[#allocation5 + $0x134] ss:$24 sps:$4 sm:$0xff]  }
  0x6b   : > { %693 = vmatpush1.bf16.msra.mxu1 %v1110_v25  ;;  %651 = vmatprep.subr.bf16.mxu0 %v1111_v26  ;;  %s275_s14 = scalar_lea.vmem [#allocation7], %s1005_s11  ;;  %s1006_s8 = smul.u32 768, %s1299_s21 }
  0x6c   : > { %694 = vmatprep.subr.bf16.mxu1 %v1114_v28  ;;  %s831_s16 = sshll.u32 %s275_s14, 4  ;;  %s815_s21 = scalar_lea.sflag [#allocation4], %s1501_s17  ;;  %s1534_s16 = int_to_ptr.vmem [resolvable:$true] %s831_s16 }
  0x6d   : > { %s1539_s7 = scalar_lea.hbm %s1593_s5, %s1006_s8  ;;  %s1221_s27 = scalar_lea.vmem %s1534_s16, 768 }
  0x6e   : > { %652 = vmatpush1.bf16.msra.mxu0 %v1113_v27  ;;  %p1222_p13 = scmp.ne.s32.totalorder %s1534_s16, %s1221_s27  ;;  %s1316_s26 = smov [#allocation7]  }
  0x6f   : > { %695 = vmatpush1.bf16.msra.mxu1 %v1116_v29  ;;  %653 = vmatprep.subr.bf16.mxu0 %v1117_v30  ;;  %s1225_s28 = sshll.u32 %s1316_s26, 4  ;;  %s1226_s28 = int_to_ptr.vmem [resolvable:$false] %s1225_s28 }
  0x70   : > { %696 = vmatprep.subr.bf16.mxu1 %v1120_v31  ;;  %p1223_p6 = pnand %p1222_p13, %p1445_p10  ;;  %s1227_s30 = scalar_lea.vmem %s1226_s28, 1536 }
  0x71   : > { %p1228_p12 = scmp.lt.s32.totalorder %s1534_s16, %s1226_s28  ;;  %p1229_p11 = scmp.lt.s32.totalorder %s1227_s30, %s1221_s27 }
  0x72   : > { %654 = vmatpush1.bf16.msra.mxu0 %v1119_v32  ;;  %p1224_p8 = pneg %p1223_p6 }
  0x73   : > { %697 = vmatpush1.bf16.msra.mxu1 %v1122_v33  ;;  %655 = vmatprep.subr.bf16.mxu0 %v1123_v34  ;;  %p1230_p0 = por %p1229_p11, %p1228_p12 }
  0x74   : > { %698 = vmatprep.subr.bf16.mxu1 %v1126_v35 }
  0x75   : > { %p1231_p5 = pnand %p1230_p0, %p1224_p8 }
  0x76   : > { %656 = vmatpush1.bf16.msra.mxu0 %v1125_v37 }
  0x77   : > { %699 = vmatpush1.bf16.msra.mxu1 %v1128_v38  ;;  %657 = vmatprep.subr.bf16.mxu0 %v1129_v39 }
  0x78   : > { %700 = vmatprep.subr.bf16.mxu1 %v1132_v40 }
  0x7a   : > { %658 = vmatpush1.bf16.msra.mxu0 %v1131_v41 }
  0x7b   : > { %701 = vmatpush1.bf16.msra.mxu1 %v1134_v42  ;;  %729 = vmatprep.subr.bf16.mxu0 %v1137_v43 }
  0xe9   : > { %v282_v9 = vpop.xlane.xlu0 %281 }
  0xea   : > { %v286_v10 = vmul.f32 0.0078125, %v282_v9  ;;  %v1153_v9 = vld [vmem:[#allocation5 + $0x130] ss:$24 sps:$4 sm:$0xff]  }
  0xec   : > { %v1513_v11 = vsub.f32 %v279_v0, %v286_v10  ;;  %v1143_v0 = vld [vmem:[#allocation5 + $0x74] ss:$24 sps:$4 sm:$0xff]   ;;  %v1158_v10 = vld [vmem:[#allocation5 + $0x164] ss:$24 sps:$4 sm:$0xff]  }
  0xed   : > { %v284_v12 = vpop.xlane.xlu0 %283 }
  0xee   : > { %v287_v13 = vmul.f32 0.0078125, %v284_v12  ;;  %v290_v14 = vmul.f32 %v1513_v11, %v1513_v11  ;;  %v373_v12 = vlaneseq }
  0xf0   : > { %v1517_v15 = vsub.f32 %v280_v1, %v287_v13  ;;  %292 = vadd.xlane.f32.xlu1 %v290_v14  ;;  %v1141_v1 = vld [vmem:[#allocation5 + $0x70] ss:$24 sps:$4 sm:$0xff]   ;;  %v374_v13 = vshrl.u32 %v373_v12, 7 }
  0xf2   : > { %v291_v16 = vmul.f32 %v1517_v15, %v1517_v15  ;;  %v375_v14 = vsub.s32 0, %v374_v13  ;;  %v379_v17 = vsub.s32 1, %v374_v13  ;;  %v387_v18 = vsub.s32 3, %v374_v13 }
  0xf3   : > { %v391_v43 = vsub.s32 4, %v374_v13 }
  0xf4   : > { %294 = vadd.xlane.f32.xlu1 %v291_v16  ;;  %v371_v16 = vld [vmem:[%s1592_s4] sm:$0x3f] }
  0xf5   : > { %v376_v19 = vrot.slane %v371_v16, %v375_v14  ;;  %v380_v21 = vrot.slane %v371_v16, %v379_v17  ;;  %v388_v22 = vrot.slane %v371_v16, %v387_v18 }
 0x17d   : > { %v293_v44 = vpop.xlane.xlu1 %292 }
 0x17e   : > { %v296_v45 = vmul.f32 0.0078125, %v293_v44  ;;  %v395_v44 = vsub.s32 5, %v374_v13 }
 0x180   : > { %v298_v46 = vadd.f32 1e-05, %v296_v45  ;;  %v392_v45 = vrot.slane %v371_v16, %v391_v43 }
 0x181   : > { %v295_v47 = vpop.xlane.xlu1 %294 }
 0x182   : > { %1159 = vrsqrt.f32 %v298_v46  ;;  %v297_v48 = vmul.f32 0.0078125, %v295_v47  ;;  %v396_v46 = vrot.slane %v371_v16, %v395_v44 }
 0x184   : > { %v299_v49 = vadd.f32 1e-05, %v297_v48 }
 0x186   : > { %1161 = vrsqrt.f32 %v299_v49 }
 0x18c   : > { %v1160_v50 = vpop.eup %1159 }
 0x18d   : > { %v302_v51 = vmul.f32 %v1160_v50, %v1513_v11  ;;  %v1156_v11 = vld [vmem:[#allocation5 + $0x160] ss:$24 sps:$4 sm:$0xff]  }
 0x18f   : > { %v311_v55 = vmul.f32 %v939_v52, %v302_v51 }
 0x190   : > { %v1162_v53 = vpop.eup %1161 }
 0x191   : > { %v303_v54 = vmul.f32 %v1162_v53, %v1517_v15  ;;  %v320_v58 = vadd.f32 %v940_v56, %v311_v55  ;;  %v383_v15 = vsub.s32 2, %v374_v13 }
 0x193   : > { %v312_v57 = vmul.f32 %v939_v52, %v303_v54  ;;  %v384_v20 = vrot.slane %v371_v16, %v383_v15 }
 0x195   : > { %v321_v59 = vadd.f32 %v940_v56, %v312_v57 }
 0x197   : > { %v322_v61 = vpack.c.bf16 %v321_v59, %v320_v58 }
 0x199   : > { %676 = vmatmul.mubr.bf16.vlgmr.msra.gmra.mrb[0].mxu0 %v322_v61  ;;  %719 = vmatmul.mubr.bf16.vlgmr.msra.gmra.mrb[0].mxu1 %v322_v61 }
 0x19a   : > { %730 = vmatpush1.bf16.msra.mxu0 %v1135_v60  ;;  %761 = vmatprep.mubr.bf16.mxu0 %v1315_v36 }
 0x19b   : > { %731 = vmatprep.subr.bf16.mxu0 %v1140_v62 }
 0x19e   : > { %732 = vmatpush1.bf16.msra.mxu0 %v1138_v63 }
 0x19f   : > { %733 = vmatprep.subr.bf16.mxu0 %v1143_v0 }
 0x1a2   : > { %734 = vmatpush1.bf16.msra.mxu0 %v1141_v1 }
 0x1a3   : > { %735 = vmatprep.subr.bf16.mxu0 %v1146_v2 }
 0x1a6   : > { %736 = vmatpush1.bf16.msra.mxu0 %v1144_v3 }
 0x1a7   : > { %737 = vmatprep.subr.bf16.mxu0 %v1149_v4 }
 0x1aa   : > { %738 = vmatpush1.bf16.msra.mxu0 %v1147_v5 }
 0x1ab   : > { %739 = vmatprep.subr.bf16.mxu0 %v1152_v6 }
 0x1ae   : > { %740 = vmatpush1.bf16.msra.mxu0 %v1150_v7 }
 0x1af   : > { %741 = vmatprep.subr.bf16.mxu0 %v1155_v8 }
 0x1b2   : > { %742 = vmatpush1.bf16.msra.mxu0 %v1153_v9 }
 0x1b3   : > { %743 = vmatprep.subr.bf16.mxu0 %v1158_v10 }
 0x1b6   : > { %744 = vmatpush1.bf16.msra.mxu0 %v1156_v11 }
 0x1b9   : > { %762 = vmatmul.mubr.bf16.vlgmr.msra.gmra.mrb[4].mxu0 %v322_v61 }
 0x26c   : > { %v677_v23 = vpop.f32.mrb[0].mxu0  ;;  %v720_v24 = vpop.f32.mrb[0].mxu1 }
 0x26d   : > { %v678_v25 = vadd.f32 %v677_v23, %v376_v19  ;;  %v721_v26 = vadd.f32 %v720_v24, %v384_v20  ;;  %v679_v27 = vpop.f32.mrb[1].mxu0  ;;  %v722_v28 = vpop.f32.mrb[1].mxu1 }
 0x26e   : > { %v680_v29 = vadd.f32 %v679_v27, %v380_v21  ;;  %v723_v30 = vadd.f32 %v722_v28, %v388_v22  ;;  %v681_v31 = vpop.f32.mrb[2].mxu0  ;;  %v724_v32 = vpop.f32.mrb[2].mxu1 }
 0x26f   : > { %v682_v33 = vadd.f32 %v681_v31, %v376_v19  ;;  %v725_v34 = vadd.f32 %v724_v32, %v384_v20  ;;  %v683_v35 = vpop.f32.mrb[3].mxu0  ;;  %v726_v36 = vpop.f32.mrb[3].mxu1 }
 0x270   : > { %v999_v37 = vpack.c.bf16 %v680_v29, %v678_v25  ;;  %v1000_v38 = vpack.c.bf16 %v723_v30, %v721_v26  ;;  %v684_v39 = vadd.f32 %v683_v35, %v380_v21  ;;  %v727_v40 = vadd.f32 %v726_v36, %v388_v22 }
 0x272   : > { %808 = vst [vmem:[%s275_s14] sm:$0xff] %v999_v37  ;;  %809 = vst [vmem:[%s275_s14 + $0x8] sm:$0xff] %v1000_v38  ;;  %v1002_v41 = vpack.c.bf16 %v684_v39, %v682_v33  ;;  %v1003_v42 = vpack.c.bf16 %v727_v40, %v725_v34 }
 0x274   : > { %811 = vst [vmem:[%s275_s14 + $0x18] sm:$0xff] %v1002_v41  ;;  %812 = vst [vmem:[%s275_s14 + $0x20] sm:$0xff] %v1003_v42 }
 0x28c   : > { %v763_v47 = vpop.f32.mrb[4].mxu0 }
 0x28d   : > { %v764_v48 = vadd.f32 %v763_v47, %v392_v45  ;;  %v765_v49 = vpop.f32.mrb[5].mxu0 }
 0x28e   : > { %v766_v50 = vadd.f32 %v765_v49, %v396_v46  ;;  %v767_v51 = vpop.f32.mrb[6].mxu0 }
 0x28f   : > { %v768_v52 = vadd.f32 %v767_v51, %v392_v45  ;;  %v769_v53 = vpop.f32.mrb[7].mxu0 }
 0x290   : > { %v1001_v54 = vpack.c.bf16 %v766_v50, %v764_v48  ;;  %v770_v55 = vadd.f32 %v769_v53, %v396_v46 }
 0x292   : > { %810 = vst [vmem:[%s275_s14 + $0x10] sm:$0xff] %v1001_v54  ;;  %v1004_v56 = vpack.c.bf16 %v770_v55, %v768_v52 }
 0x294   : > { %813 = vst [vmem:[%s275_s14 + $0x28] sm:$0xff] %v1004_v56 }
 0x295   : > { %1234 = shalt.err (!%p1231_p5)
}
 0x296   : > { %s1235_s25 = scalar_lea.hbm %s1539_s7, 768  ;;  %s1239_s11 = scalar_lea.hbm %s1593_s5, 1536 }
 0x297   : > { %p1236_p9 = scmp.ne.s32.totalorder %s1539_s7, %s1235_s25  ;;  %p1240_p3 = scmp.lt.u32.totalorder %s1539_s7, %s1593_s5 }
 0x298   : > { %p1241_p7 = scmp.lt.u32.totalorder %s1239_s11, %s1235_s25  ;;  %p1243_p13 = scmp.lt.u32.totalorder %s1235_s25, %s1539_s7 }
 0x299   : > { %p1237_p1 = pnand %p1236_p9, %p1445_p10 }
 0x29a   : > { %p1242_p4 = por %p1241_p7, %p1240_p3 }
 0x29b   : > { %p1238_p2 = pneg %p1237_p1 }
 0x29c   : > { %p1244_p6 = por %p1243_p13, %p1242_p4 }
 0x29e   : > { %p1245_p8 = pnand %p1244_p6, %p1238_p2 }
 0x2a0   : > { %1248 = shalt.err (!%p1245_p8)
}
 0x2a1   : > { %s1317_s12 = smov 384   ;;  %s1318_s24 = smov 24  }
 0x2a2   : > { %1013 = dma.vmem_to_hbm [thread:$0]  (%p1445_p10), %s1534_s16, 768, %s1539_s7, %s815_s21, %s1317_s12, %s1317_s12, %s1318_s24  }
 0x2a3 PF: > { %s846_s27 = sand.u32 1, %s1287_s18   ;;  %p1611_p12 = scmp.ne.s32.totalorder %s1601_s29, 0 }
 0x2a4   : > { %p1612_p11 = scmp.ge.s32.totalorder %s1307_s23, 2  ;;  %s847_s26 = scalar_lea.sflag [#allocation4], %s846_s27 }
 0x2a6   : > { %p1024_p0 = pnand %p1612_p11, %p1611_p12 }
 0x2a8   : > { %1282 = dma.done.wait (!%p1024_p0), %s847_s26, 768  }
 0x2a9   : > { %1284 = vsyncadd (!%p1024_p0), %s847_s26, 4294966528  ;;  %s22_s23 = sadd.s32 1, %s1307_s23   ;;  %s1613_s18 = smov %s1291_s19 }
 0x2aa   : > { %p19_p5 = scmp.ge.s32.totalorder %s22_s23, 4   ;;  %s1614_s19 = smov %s1295_s20 }
 0x2ab   : > { %s1615_s20 = smov %s1454_s15  ;;  %s1616_s21 = smov %s1303_s22 }
 0x2ac   : > { %s1617_s22 = smov %s1619_s9  ;;  %21 = sbr.rel (!%p19_p5) target bundleno = 7 (0x7), region = 89 }
 0x2b3   :  { %852 = vsyncpa [#allocation3], 1 }
 0x2b4   :  { %854 = vsyncpa [#allocation3 + $0x1], 1 }
 0x2b5   :  { %855 = vsyncpa [#allocation6], 1 }
 0x2b6   :  { %856 = vsyncpa [#allocation4], 1 }
 0x2b7   :  { %858 = vsyncpa [#allocation4 + $0x1], 1 }

</bundles_post_ra>
